<compile_context>
chip_gen: v6e
topology: v6e:2x2x1
jax: 0.10.0
libtpu: 0.0.40
codegen_flags: <defaults>
</compile_context>

<pallas_src>
import functools
import math

import jax
import jax.numpy as jnp
from jax.experimental import pallas as pl
from jax.experimental.pallas import tpu as pltpu


def _label_smoothing_kernel(x_ref, t_ref, out_ref, *, padding_idx, low,
                            confidence, c_entropy):
    x = x_ref[...]                                # (tm, V) log-probs
    if x.dtype != jnp.float32:                    # allow bf16 inputs (halved HBM traffic)
        x = x.astype(jnp.float32)
    tgt = t_ref[...]                              # (tm, 1) int32 labels

    col = jax.lax.broadcasted_iota(jnp.int32, x.shape, 1)

    # Weight is `confidence` at the target column, `low` everywhere else:
    # one compare + one select + one mul per element, then a lane reduce.
    w = jnp.where(col == tgt, jnp.float32(confidence), jnp.float32(low))
    dot = jnp.sum(w * x, axis=-1, keepdims=True)  # (tm, 1)

    # The padding column must carry weight 0; for non-padding rows it currently
    # carries `low`, so remove that contribution (static lane slice).
    dot = dot - jnp.float32(low) * x[:, padding_idx:padding_idx + 1]

    row_loss = jnp.float32(c_entropy) - dot
    # Rows whose target is the padding index contribute nothing.
    row_loss = jnp.where(tgt == padding_idx, 0.0, row_loss)

    out_ref[...] = row_loss


def _pick_block_rows(n_rows, vocab, itemsize, vmem_budget_bytes=24 << 20):
    """Largest row-tile whose double-buffered x block stays within the budget."""
    # 2 (double buffer) * block_rows * vocab * itemsize <= budget
    max_rows = (vmem_budget_bytes // (2 * vocab * itemsize)) // 8 * 8
    max_rows = max(8, min(max_rows, 1024))        # diminishing returns past ~1K rows
    if n_rows <= max_rows:
        return max(8, ((n_rows + 7) // 8) * 8)    # one block covers everything
    return max_rows


def label_smoothing_loss(x, target, *, size, padding_idx, smoothing,
                         block_rows=None):
    """x: (N, V) float32/bf16 log-probs, target: (N,) int. Returns scalar loss."""
    N, V = x.shape
    assert V == size
    confidence = 1.0 - smoothing
    low = smoothing / (size - 2)

    # Compile-time entropy constant: sum of td*log(td) over the (V-2) `low`
    # entries plus the single `confidence` entry (0-weight entries contribute 0).
    c_entropy = 0.0
    if confidence > 0.0:
        c_entropy += confidence * math.log(confidence)
    if low > 0.0:
        c_entropy += (size - 2) * low * math.log(low)

    if block_rows is None:
        block_rows = _pick_block_rows(N, V, jnp.dtype(x.dtype).itemsize)

    # Pad the token dimension so the grid tiles it exactly; padded rows use
    # target == padding_idx, which makes their contribution exactly zero.
    n_blocks = pl.cdiv(N, block_rows)
    N_pad = n_blocks * block_rows
    target2d = target.astype(jnp.int32).reshape(N, 1)
    if N_pad != N:
        x = jnp.pad(x, ((0, N_pad - N), (0, 0)))
        target2d = jnp.pad(target2d, ((0, N_pad - N), (0, 0)),
                           constant_values=padding_idx)

    kernel = functools.partial(
        _label_smoothing_kernel,
        padding_idx=padding_idx, low=low,
        confidence=confidence, c_entropy=c_entropy)

    row_losses = pl.pallas_call(
        kernel,
        out_shape=jax.ShapeDtypeStruct((N_pad, 1), jnp.float32),
        grid_spec=pltpu.PrefetchScalarGridSpec(
            num_scalar_prefetch=0,
            grid=(n_blocks,),
            in_specs=[
                pl.BlockSpec((block_rows, V), lambda i: (i, 0)),
                pl.BlockSpec((block_rows, 1), lambda i: (i, 0)),
            ],
            out_specs=pl.BlockSpec((block_rows, 1), lambda i: (i, 0)),
        ),
        compiler_params=pltpu.CompilerParams(
            dimension_semantics=("parallel",),     # no cross-step state -> megacore OK
            vmem_limit_bytes=32 * 1024 * 1024,     # lift v5e's 16 MiB scoped default
        ),
    )(x, target2d)

    # Padded rows are exactly zero, so summing everything is safe.
    return jnp.sum(row_losses)


def _reference_loss(x, target, *, size, padding_idx, smoothing):
    confidence = 1.0 - smoothing
    N, V = x.shape
    col = jnp.arange(V)[None, :]
    tgt = target[:, None]
    td = jnp.full((N, V), smoothing / (size - 2), jnp.float32)
    td = jnp.where(col == tgt, confidence, td)
    td = jnp.where(col == padding_idx, 0.0, td)
    td = jnp.where(tgt == padding_idx, 0.0, td)
    return jnp.sum(jnp.where(td > 0, td * (jnp.log(td) - x), 0.0))


if __name__ == "__main__":
    key = jax.random.PRNGKey(0)
    N, V = 16, 32                  # N tokens, vocab size == self.size
    padding_idx = 0
    smoothing = 0.1

    kx, kt = jax.random.split(key)
    logits = jax.random.normal(kx, (N, V), dtype=jnp.float32)
    x = jax.nn.log_softmax(logits, axis=-1)
    target = jax.random.randint(kt, (N,), 0, V, dtype=jnp.int32)
    # make sure some targets hit the padding index (exercises the row masking)
    target = target.at[3].set(padding_idx).at[11].set(padding_idx)

    loss = label_smoothing_loss(x, target, size=V, padding_idx=padding_idx,
                                smoothing=smoothing)
    loss = jax.block_until_ready(loss)

    ref = _reference_loss(x, target, size=V, padding_idx=padding_idx,
                          smoothing=smoothing)
    assert jnp.allclose(loss, ref, rtol=1e-5, atol=1e-4), (loss, ref)
    print("KERNEL_OK")
</pallas_src>

<mosaic_0001>
module attributes {stable_mosaic.version = 11 : i64} {
  func.func @_label_smoothing_kernel(%arg0: i32, %arg1: memref<16x32xf32, #tpu.memory_space<vmem>>, %arg2: memref<16x1xi32, #tpu.memory_space<vmem>>, %arg3: memref<16x1xf32, #tpu.memory_space<vmem>>) attributes {dimension_semantics = [#tpu.dimension_semantics<parallel>], iteration_bounds = array<i64: 1>, scalar_prefetch = 0 : i64, scratch_operands = 0 : i64, tpu.core_type = #tpu.core_type<tc>, window_params = [{transform_indices = @transform_0, window_bounds = array<i64: 16, 32>}, {transform_indices = @transform_1, window_bounds = array<i64: 16, 1>}, {transform_indices = @transform_2, window_bounds = array<i64: 16, 1>}]} {
    %c0 = arith.constant 0 : index
    %c0_0 = arith.constant 0 : index
    %0 = vector.load %arg1[%c0, %c0_0] : memref<16x32xf32, #tpu.memory_space<vmem>>, vector<16x32xf32>
    %c0_1 = arith.constant 0 : index
    %c0_2 = arith.constant 0 : index
    %1 = vector.load %arg2[%c0_1, %c0_2] : memref<16x1xi32, #tpu.memory_space<vmem>>, vector<16x1xi32>
    %2 = tpu.iota {dimensions = array<i32: 1>} : vector<16x32xi32>
    %3 = vector.broadcast %1 : vector<16x1xi32> to vector<16x32xi32>
    %4 = arith.cmpi eq, %2, %3 : vector<16x32xi32>
    %cst = arith.constant 0.899999976 : f32
    %cst_3 = arith.constant 0.00333333341 : f32
    %5 = vector.broadcast %cst : f32 to vector<16x32xf32>
    %6 = vector.broadcast %cst_3 : f32 to vector<16x32xf32>
    %7 = arith.select %4, %5, %6 : vector<16x32xi1>, vector<16x32xf32>
    %8 = arith.mulf %7, %0 : vector<16x32xf32>
    %cst_4 = arith.constant dense<0.000000e+00> : vector<16xf32>
    %9 = vector.multi_reduction <add>, %8, %cst_4 [1] : vector<16x32xf32> to vector<16xf32>
    %10 = vector.shape_cast %9 : vector<16xf32> to vector<16x1xf32>
    %11 = vector.extract_strided_slice %0 {offsets = [0, 0], sizes = [16, 1], strides = [1, 1]} : vector<16x32xf32> to vector<16x1xf32>
    %cst_5 = arith.constant 0.00333333341 : f32
    %12 = vector.broadcast %cst_5 : f32 to vector<16x1xf32>
    %13 = arith.mulf %12, %11 : vector<16x1xf32>
    %14 = arith.subf %10, %13 : vector<16x1xf32>
    %cst_6 = arith.constant -0.665202737 : f32
    %15 = vector.broadcast %cst_6 : f32 to vector<16x1xf32>
    %16 = arith.subf %15, %14 : vector<16x1xf32>
    %c0_i32 = arith.constant 0 : i32
    %17 = vector.broadcast %c0_i32 : i32 to vector<16x1xi32>
    %18 = arith.cmpi eq, %1, %17 : vector<16x1xi32>
    %cst_7 = arith.constant 0.000000e+00 : f32
    %19 = vector.broadcast %cst_7 : f32 to vector<16x1xf32>
    %20 = arith.select %18, %19, %16 : vector<16x1xi1>, vector<16x1xf32>
    %c0_8 = arith.constant 0 : index
    %c0_9 = arith.constant 0 : index
    %21 = vector.load %arg3[%c0_8, %c0_9] : memref<16x1xf32, #tpu.memory_space<vmem>>, vector<16x1xf32>
    tpu.vector_store %arg3[%c0_8, %c0_9], %20 {strides = array<i32>} : memref<16x1xf32, #tpu.memory_space<vmem>>, vector<16x1xf32>,
    return
  }
  func.func @transform_0(%arg0: i32) -> (i32, i32) {
    %c0_i32 = arith.constant 0 : i32
    %c0_i32_0 = arith.constant 0 : i32
    return %arg0, %c0_i32 : i32, i32
  }
  func.func @transform_1(%arg0: i32) -> (i32, i32) {
    %c0_i32 = arith.constant 0 : i32
    %c0_i32_0 = arith.constant 0 : i32
    return %arg0, %c0_i32 : i32, i32
  }
  func.func @transform_2(%arg0: i32) -> (i32, i32) {
    %c0_i32 = arith.constant 0 : i32
    %c0_i32_0 = arith.constant 0 : i32
    return %arg0, %c0_i32 : i32, i32
  }
}

</mosaic_0001>

<bundles_post_ra>
// kernel: tpu_custom_call.1
= control target key start
LH: loop header
LB: loop body
LE: loop exit
PB: predicated region body
PF: predicated region fallthrough
CT: control target
= control target key end

     0   :  { %v56_v0 = vmov 0   ;;  %v15_v3 = vlaneseq  ;;  %v57_v7 = vmov 0.0033333334   ;;  %vm29_vm1 = vcmask 261120   ;;  %s91_s1 = inlined_call_operand.vmem [shape: s32[16,1], index: 1, kind: input, shape index: {}]   ;;  %s92_s0 = inlined_call_operand.vmem [shape: f32[16,32], index: 0, kind: input, shape index: {}]   ;;  %s93_s2 = inlined_call_operand.vmem [shape: f32[16,1], index: 2, kind: output, shape index: {}]  }
   0x1   :  { %55 = vset.pattern.permute.xlu0 %v56_v0  ;;  %v13_v1 = vld [vmem:[%s91_s1] sm:$0xff]  ;;  %v14_v2 = vld [vmem:[%s91_s1 + $0x8] sm:$0xff]  ;;  %vm46_vm4 = vcmask 7168  }
   0x2   :  { %18 = vperm.xlu0 %55, %v13_v1   ;;  %v16_v4 = vand.u32 127, %v15_v3  ;;  %v11_v6 = vld [vmem:[%s92_s0] sm:$0xff]  ;;  %v12_v11 = vld [vmem:[%s92_s0 + $0x8] sm:$0xff]  ;;  %vm42_vm3 = vcmp.eq.s32.totalorder %v13_v1, 0  ;;  %vm43_vm5 = vcmp.eq.s32.totalorder %v14_v2, 0 }
   0x3   :  { %v36_v16 = vmul.f32 0.0033333334, %v11_v6  ;;  %v37_v19 = vmul.f32 0.0033333334, %v12_v11 }
   0x6   :  { %21 = vperm.xlu0 %55, %v14_v2  }
  0x7d   :  { %v19_v5 = vpop.permute.xlu0 %18 }
  0x7e   :  { %vm23_vm0 = vcmp.eq.s32.totalorder %v16_v4, %v19_v5 }
  0x7f   :  { %v25_v8 = vsel %vm23_vm0, 0.9, %v57_v7 }
  0x80   :  { %v27_v9 = vmul.f32 %v25_v8, %v11_v6 }
  0x81   :  { %v22_v10 = vpop.permute.xlu0 %21 }
  0x82   :  { %vm24_vm2 = vcmp.eq.s32.totalorder %v16_v4, %v22_v10  ;;  %v30_v12 = vsel %vm29_vm1, %v27_v9, 0.0 }
  0x83   :  { %v26_v13 = vsel %vm24_vm2, 0.9, %v57_v7  ;;  %31 = vadd.xlane.f32.xlu1 %v30_v12 }
  0x84   :  { %v28_v14 = vmul.f32 %v26_v13, %v12_v11 }
  0x86   :  { %v33_v15 = vsel %vm29_vm1, %v28_v14, 0.0 }
  0x87   :  { %34 = vadd.xlane.f32.xlu1 %v33_v15 }
 0x10c   :  { %v32_v17 = vpop.xlane.xlu1 %31 }
 0x10d   :  { %v38_v18 = vsub.f32 %v32_v17, %v36_v16 }
 0x10f   :  { %v40_v20 = vsub.f32 -0.66520274, %v38_v18 }
 0x110   :  { %v35_v21 = vpop.xlane.xlu1 %34 }
 0x111   :  { %v44_v22 = vsel %vm42_vm3, 0.0, %v40_v20  ;;  %v39_v23 = vsub.f32 %v35_v21, %v37_v19 }
 0x112   :  { %47 = vst.msk [vmem:[%s93_s2] sm:$0xff] %vm46_vm4, %v44_v22 }
 0x113   :  { %v41_v24 = vsub.f32 -0.66520274, %v39_v23 }
 0x115   :  { %v45_v25 = vsel %vm43_vm5, 0.0, %v41_v24 }
 0x116   :  { %48 = vst.msk [vmem:[%s93_s2 + $0x8] sm:$0xff] %vm46_vm4, %v45_v25 }

</bundles_post_ra>
